<compile_context>
chip_gen: v7x
topology: tpu7x:2x2x1
jax: 0.10.0
libtpu: 0.0.40
codegen_flags: <defaults>
</compile_context>

<pallas_src>
import math

import jax
import jax.numpy as jnp
from jax import lax
from jax.experimental import pallas as pl
from jax.experimental.pallas import tpu as pltpu


def _round_up(x, m):
    return ((x + m - 1) // m) * m


def _pair(v):
    return (v, v) if isinstance(v, int) else tuple(v)


def _pick_tile(dim, align, candidates, cap):
    """Return (tile, padded_dim): full extent if it fits under `cap`, otherwise
    the candidate tile (descending) that wastes the least padding."""
    dim_a = _round_up(dim, align)
    if dim_a <= cap:
        return dim_a, dim_a
    best_t, best_p = None, None
    for c in candidates:                       # descending; ties -> larger tile
        p = _round_up(dim, c)
        if best_p is None or p < best_p:
            best_t, best_p = c, p
    return best_t, best_p


# ----------------------------------------------------------------------------
# Pallas kernel: tiled GEMM (weight @ patches) + bias + ReLU epilogue.
# ----------------------------------------------------------------------------
def _gemm_bias_relu_kernel(w_ref, x_ref, b_ref, o_ref, acc_ref):
    # w_ref: (tn, tk) bf16 weight rows (LHS, canonical [n, k] — no transpose)
    # x_ref: (tk, tm) bf16 K-major im2col patches (RHS, canonical [k, m])
    # b_ref: (tn, 1)  f32 bias column
    # o_ref: (tn, tm) output tile; acc_ref: (tn, tm) f32 accumulator.
    # NOTE: the reduction axis k MUST be the innermost (last) grid axis for the
    # zero-init / epilogue pattern below to be correct.
    @pl.when(pl.program_id(3) == 0)
    def _():
        acc_ref[...] = jnp.zeros_like(acc_ref)

    acc_ref[...] += jnp.dot(w_ref[...], x_ref[...],
                            preferred_element_type=jnp.float32)

    @pl.when(pl.program_id(3) == pl.num_programs(3) - 1)
    def _():
        # Epilogue stays in f32 (VPU-safe on v5e; negligible cost everywhere).
        y = acc_ref[...] + b_ref[...]            # (tn, 1) broadcast over lanes
        o_ref[...] = jnp.maximum(y, 0.0).astype(o_ref.dtype)


def _grouped_gemm_bias_relu(patches_t, weight, bias, out_dtype,
                            compute_dtype=jnp.bfloat16):
    """relu(weight @ patches_t + bias) per group with a tiled Pallas GEMM.

    patches_t: [G, Kg, M]   K-major im2col patches
    weight:    [G, N,  Kg]  PyTorch-layout weight rows per group
    bias:      [G, N,  1]
    returns    [G, N,  M]
    """
    G, Kg, M = patches_t.shape
    N = weight.shape[1]

    # bf16 operands feed the MXU; accumulation / epilogue stay f32.
    patches_t = patches_t.astype(compute_dtype)
    weight = weight.astype(compute_dtype)
    bias = bias.astype(jnp.float32)

    # Tile selection: lane dims multiples of 128, sublane multiples of 16 (so
    # bf16 weight blocks and sub-32-bit outputs are always legally tiled).
    tn, Np = _pick_tile(N, 16, (512, 256, 128), cap=512)
    tm, Mp = _pick_tile(M, 128, (512, 256, 128), cap=512)
    tk, Kp = _pick_tile(Kg, 128, (2048, 1024, 512, 256), cap=2048)

    # Keep >= 2 parallel grid blocks so both v7x TensorCores get work.
    while G * (Np // tn) * (Mp // tm) < 2 and tm > 128 and Mp % (tm // 2) == 0:
        tm //= 2

    if (Kp, Mp) != (Kg, M):
        patches_t = jnp.pad(patches_t, ((0, 0), (0, Kp - Kg), (0, Mp - M)))
    if (Np, Kp) != (N, Kg):
        weight = jnp.pad(weight, ((0, 0), (0, Np - N), (0, Kp - Kg)))
    if Np != N:
        bias = jnp.pad(bias, ((0, 0), (0, Np - N), (0, 0)))

    cdt = jnp.dtype(compute_dtype).itemsize
    cost = pl.CostEstimate(                       # advisory; operands counted once
        flops=2 * G * Np * Mp * Kp, transcendentals=0,
        bytes_accessed=G * ((Np * Kp + Kp * Mp) * cdt
                            + Np * Mp * jnp.dtype(out_dtype).itemsize))

    out = pl.pallas_call(
        _gemm_bias_relu_kernel,
        out_shape=jax.ShapeDtypeStruct((G, Np, Mp), out_dtype),
        grid_spec=pltpu.PrefetchScalarGridSpec(
            num_scalar_prefetch=0,
            grid=(G, Np // tn, Mp // tm, Kp // tk),          # k innermost
            in_specs=[
                # Weight block index is constant across the i (M) loop when
                # grid_k == 1 (the common case), so it stays VMEM-resident.
                pl.BlockSpec((None, tn, tk), lambda g, j, i, k: (g, j, k)),
                pl.BlockSpec((None, tk, tm), lambda g, j, i, k: (g, k, i)),
                pl.BlockSpec((None, tn, 1), lambda g, j, i, k: (g, j, 0)),
            ],
            out_specs=pl.BlockSpec((None, tn, tm), lambda g, j, i, k: (g, j, i)),
            scratch_shapes=[pltpu.VMEM((tn, tm), jnp.float32)],
        ),
        compiler_params=pltpu.CompilerParams(
            dimension_semantics=("parallel", "parallel", "parallel", "arbitrary"),
            vmem_limit_bytes=32 * 1024 * 1024),
        cost_estimate=cost,
    )(weight, patches_t, bias)
    return out[:, :N, :M]


# ----------------------------------------------------------------------------
# Wrapper glue: K-major im2col + group handling + NCHW layout.
# ----------------------------------------------------------------------------
def _im2col_kmajor(x, KH, KW, stride, padding, dilation):
    """x: [B, C, H, W] -> patches [C*KH*KW, B*OH*OW] with (C, KH, KW) K order."""
    # TODO(synk): an implicit-GEMM kernel (reduction grid axis over (kh,kw,C))
    # would avoid materializing the KH*KW-amplified patches in HBM entirely.
    B, C, H, W = x.shape
    sh, sw = stride
    ph, pw = padding
    dh, dw = dilation
    x_pad = jnp.pad(x, ((0, 0), (0, 0), (ph, ph), (pw, pw)))
    Hp, Wp = H + 2 * ph, W + 2 * pw
    OH = (Hp - dh * (KH - 1) - 1) // sh + 1
    OW = (Wp - dw * (KW - 1) - 1) // sw + 1
    cols = []
    for kh in range(KH):
        for kw in range(KW):
            h0, w0 = kh * dh, kw * dw
            cols.append(x_pad[:, :, h0:h0 + (OH - 1) * sh + 1:sh,
                              w0:w0 + (OW - 1) * sw + 1:sw])   # [B, C, OH, OW]
    patches = jnp.stack(cols, axis=0).reshape(KH, KW, B, C, OH, OW)
    # K-major layout [C, KH, KW, B, OH, OW]: only leading axes move, OH*OW stays
    # contiguous, and the GEMM output gets the big B*OH*OW axis as lanes.
    patches = patches.transpose(3, 0, 1, 2, 4, 5)
    return patches.reshape(C * KH * KW, B * OH * OW), OH, OW


def lgr_conv2d_forward(x, weight, bias=None, stride=1, padding=0, dilation=1,
                       groups=1, l=0.01, k=5.0, p=0.0,
                       compute_dtype=jnp.bfloat16):
    """Pallas equivalent of LGRConv2d.forward: relu(conv2d(x, W, b)).

    x:      [B, Cin, H, W]      (NCHW, like PyTorch)
    weight: [Cout, Cin//groups, KH, KW]
    bias:   [Cout] or None
    l, k, p only shape the custom LGR backward and do not affect the forward.
    """
    B, Cin, H, W = x.shape
    Cout, Cin_g, KH, KW = weight.shape
    stride, padding, dilation = _pair(stride), _pair(padding), _pair(dilation)
    assert Cin == Cin_g * groups and Cout % groups == 0

    patches_t, OH, OW = _im2col_kmajor(x, KH, KW, stride, padding, dilation)
    M = B * OH * OW
    Kg = Cin_g * KH * KW
    Cout_g = Cout // groups

    # Groups become a leading grid axis inside one pallas_call (no per-group
    # launches / concat); all reshapes below are free views.
    patches_t = patches_t.reshape(groups, Kg, M)
    w3 = weight.reshape(groups, Cout_g, Kg)
    if bias is None:
        bias = jnp.zeros((Cout,), dtype=jnp.float32)
    b3 = bias.reshape(groups, Cout_g, 1)

    out = _grouped_gemm_bias_relu(patches_t, w3, b3, x.dtype,
                                  compute_dtype=compute_dtype)

    # [G, Cout_g, M] -> [Cout, B, OH, OW] -> NCHW: leading-axis permute over
    # contiguous OH*OW blocks (cheap vs. a Cout-innermost shuffle).
    out = out.reshape(Cout, B, OH, OW).transpose(1, 0, 2, 3)
    return out
    # TODO(synk): the custom LGR backward (kernel = l/(1+|z|/(l*k)) etc.) is
    # gradient-only logic and is not part of the forward kernel.


def init_lgr_conv2d_params(key, in_channels, out_channels, kernel_size,
                           groups=1, bias=True, dtype=jnp.float32):
    # kaiming_uniform_(a=sqrt(5)) -> U(-bound, bound), bound = 1/sqrt(fan_in)
    fan_in = (in_channels // groups) * kernel_size * kernel_size
    bound = 1.0 / math.sqrt(fan_in)
    weight = jax.random.uniform(
        key, (out_channels, in_channels // groups, kernel_size, kernel_size),
        dtype=dtype, minval=-bound, maxval=bound)
    b = jnp.zeros((out_channels,), dtype=dtype) if bias else None
    return weight, b


if __name__ == "__main__":
    key = jax.random.PRNGKey(0)
    k_x, k_w = jax.random.split(key)

    B, Cin, Cout, H, W, ksize = 2, 4, 8, 16, 16, 3
    stride, padding, dilation, groups = 1, 1, 1, 1

    x = jax.random.normal(k_x, (B, Cin, H, W), dtype=jnp.float32)
    weight, bias = init_lgr_conv2d_params(k_w, Cin, Cout, ksize, groups=groups)

    y = lgr_conv2d_forward(x, weight, bias, stride=stride, padding=padding,
                           dilation=dilation, groups=groups,
                           l=0.01, k=5.0, p=0.0)
    y = jax.block_until_ready(y)

    # Reference: identical bf16 rounding of operands, then f32 conv+bias+ReLU,
    # so the check isolates kernel logic from the (intentional) bf16 cast.
    x_r = x.astype(jnp.bfloat16).astype(jnp.float32)
    w_r = weight.astype(jnp.bfloat16).astype(jnp.float32)
    y_ref = lax.conv_general_dilated(
        x_r, w_r, window_strides=(stride, stride),
        padding=[(padding, padding), (padding, padding)],
        rhs_dilation=(dilation, dilation),
        dimension_numbers=("NCHW", "OIHW", "NCHW"),
        feature_group_count=groups,
        precision=lax.Precision.HIGHEST)
    y_ref = jnp.maximum(y_ref + bias[None, :, None, None], 0.0)

    assert y.shape == (B, Cout, H, W)
    err = float(jnp.abs(y - y_ref).max())
    assert jnp.allclose(y, y_ref, atol=2e-3, rtol=2e-3), err

    print("KERNEL_OK")
</pallas_src>

<mosaic_0001>
module attributes {stable_mosaic.version = 11 : i64} {
  func.func @_gemm_bias_relu_kernel(%arg0: i32, %arg1: i32, %arg2: i32, %arg3: i32, %arg4: memref<1x16x128xbf16, #tpu.memory_space<vmem>>, %arg5: memref<1x128x256xbf16, #tpu.memory_space<vmem>>, %arg6: memref<1x16x1xf32, #tpu.memory_space<vmem>>, %arg7: memref<1x16x256xf32, #tpu.memory_space<vmem>>, %arg8: memref<16x256xf32, #tpu.memory_space<vmem>>) attributes {dimension_semantics = [#tpu.dimension_semantics<parallel>, #tpu.dimension_semantics<parallel>, #tpu.dimension_semantics<parallel>, #tpu.dimension_semantics<arbitrary>], iteration_bounds = array<i64: 1, 1, 2, 1>, scalar_prefetch = 0 : i64, scratch_operands = 1 : i64, tpu.core_type = #tpu.core_type<tc>, window_params = [{transform_indices = @transform_0, window_bounds = array<i64: 1, 16, 128>}, {transform_indices = @transform_1, window_bounds = array<i64: 1, 128, 256>}, {transform_indices = @transform_2, window_bounds = array<i64: 1, 16, 1>}, {transform_indices = @transform_3, window_bounds = array<i64: 1, 16, 256>}]} {
    %c0_i32 = arith.constant 0 : i32
    %0 = arith.cmpi eq, %arg3, %c0_i32 : i32
    %1 = arith.extui %0 : i1 to i32
    %c0_i32_0 = arith.constant 0 : i32
    %2 = arith.cmpi ne, %1, %c0_i32_0 : i32
    scf.if %2 {
      %cst_12 = arith.constant 0.000000e+00 : f32
      %14 = vector.broadcast %cst_12 : f32 to vector<16x256xf32>
      %c0_13 = arith.constant 0 : index
      %c0_14 = arith.constant 0 : index
      %15 = vector.load %arg8[%c0_13, %c0_14] : memref<16x256xf32, #tpu.memory_space<vmem>>, vector<16x256xf32>
      tpu.vector_store %arg8[%c0_13, %c0_14], %14 {strides = array<i32>} : memref<16x256xf32, #tpu.memory_space<vmem>>, vector<16x256xf32>,
    } else {
    }
    %c0 = arith.constant 0 : index
    %c0_1 = arith.constant 0 : index
    %3 = vector.load %arg8[%c0, %c0_1] : memref<16x256xf32, #tpu.memory_space<vmem>>, vector<16x256xf32>
    %c0_2 = arith.constant 0 : index
    %c0_3 = arith.constant 0 : index
    %c0_4 = arith.constant 0 : index
    %4 = vector.load %arg4[%c0_2, %c0_3, %c0_4] : memref<1x16x128xbf16, #tpu.memory_space<vmem>>, vector<1x16x128xbf16>
    %5 = vector.shape_cast %4 : vector<1x16x128xbf16> to vector<16x128xbf16>
    %c0_5 = arith.constant 0 : index
    %c0_6 = arith.constant 0 : index
    %c0_7 = arith.constant 0 : index
    %6 = vector.load %arg5[%c0_5, %c0_6, %c0_7] : memref<1x128x256xbf16, #tpu.memory_space<vmem>>, vector<1x128x256xbf16>
    %7 = vector.shape_cast %6 : vector<1x128x256xbf16> to vector<128x256xbf16>
    %cst = arith.constant dense<0.000000e+00> : vector<16x256xf32>
    %8 = tpu.matmul %5, %7, %cst {dimension_numbers = #tpu.dot_dimension_numbers<[1], [0], [0], [1], [0, 0, 1, 1], [], []>} : vector<16x128xbf16>, vector<128x256xbf16>, vector<16x256xf32> -> vector<16x256xf32>
    %9 = arith.addf %3, %8 : vector<16x256xf32>
    %c0_8 = arith.constant 0 : index
    %c0_9 = arith.constant 0 : index
    %10 = vector.load %arg8[%c0_8, %c0_9] : memref<16x256xf32, #tpu.memory_space<vmem>>, vector<16x256xf32>
    tpu.vector_store %arg8[%c0_8, %c0_9], %9 {strides = array<i32>} : memref<16x256xf32, #tpu.memory_space<vmem>>, vector<16x256xf32>,
    %c0_i32_10 = arith.constant 0 : i32
    %11 = arith.cmpi eq, %arg3, %c0_i32_10 : i32
    %12 = arith.extui %11 : i1 to i32
    %c0_i32_11 = arith.constant 0 : i32
    %13 = arith.cmpi ne, %12, %c0_i32_11 : i32
    scf.if %13 {
      %c0_12 = arith.constant 0 : index
      %c0_13 = arith.constant 0 : index
      %14 = vector.load %arg8[%c0_12, %c0_13] : memref<16x256xf32, #tpu.memory_space<vmem>>, vector<16x256xf32>
      %c0_14 = arith.constant 0 : index
      %c0_15 = arith.constant 0 : index
      %c0_16 = arith.constant 0 : index
      %15 = vector.load %arg6[%c0_14, %c0_15, %c0_16] : memref<1x16x1xf32, #tpu.memory_space<vmem>>, vector<1x16x1xf32>
      %16 = vector.shape_cast %15 : vector<1x16x1xf32> to vector<16x1xf32>
      %17 = vector.broadcast %16 : vector<16x1xf32> to vector<16x256xf32>
      %18 = arith.addf %14, %17 : vector<16x256xf32>
      %cst_17 = arith.constant 0.000000e+00 : f32
      %19 = vector.broadcast %cst_17 : f32 to vector<16x256xf32>
      %20 = arith.maximumf %18, %19 : vector<16x256xf32>
      %c0_18 = arith.constant 0 : index
      %c0_19 = arith.constant 0 : index
      %c0_20 = arith.constant 0 : index
      %21 = vector.load %arg7[%c0_18, %c0_19, %c0_20] : memref<1x16x256xf32, #tpu.memory_space<vmem>>, vector<1x16x256xf32>
      %22 = vector.shape_cast %21 : vector<1x16x256xf32> to vector<16x256xf32>
      %23 = vector.shape_cast %20 : vector<16x256xf32> to vector<1x16x256xf32>
      tpu.vector_store %arg7[%c0_18, %c0_19, %c0_20], %23 {strides = array<i32>} : memref<1x16x256xf32, #tpu.memory_space<vmem>>, vector<1x16x256xf32>,
    } else {
    }
    return
  }
  func.func @transform_0(%arg0: i32, %arg1: i32, %arg2: i32, %arg3: i32) -> (i32, i32, i32) {
    %c0_i32 = arith.constant 0 : i32
    return %arg0, %arg1, %arg3 : i32, i32, i32
  }
  func.func @transform_1(%arg0: i32, %arg1: i32, %arg2: i32, %arg3: i32) -> (i32, i32, i32) {
    %c0_i32 = arith.constant 0 : i32
    return %arg0, %arg3, %arg2 : i32, i32, i32
  }
  func.func @transform_2(%arg0: i32, %arg1: i32, %arg2: i32, %arg3: i32) -> (i32, i32, i32) {
    %c0_i32 = arith.constant 0 : i32
    %c0_i32_0 = arith.constant 0 : i32
    return %arg0, %arg1, %c0_i32 : i32, i32, i32
  }
  func.func @transform_3(%arg0: i32, %arg1: i32, %arg2: i32, %arg3: i32) -> (i32, i32, i32) {
    %c0_i32 = arith.constant 0 : i32
    return %arg0, %arg1, %arg2 : i32, i32, i32
  }
}

</mosaic_0001>

<bundles_post_ra>
// kernel: tpu_custom_call.1
= control target key start
LH: loop header
LB: loop body
LE: loop exit
PB: predicated region body
PF: predicated region fallthrough
CT: control target
= control target key end

     0   :  { %8 = vsyncpa [#allocation4], 0  ;;  %s1150_s0 = inlined_call_operand.vmem [shape: bf16[1,16,128], index: 0, kind: input, shape index: {}]   ;;  %s1151_s1 = inlined_call_operand.hbm [shape: bf16[1,128,512], index: 1, kind: input, shape index: {}]   ;;  %s1152_s2 = inlined_call_operand.vmem [shape: f32[1,16,1], index: 2, kind: input, shape index: {}]   ;;  %s1153_s3 = inlined_call_operand.hbm [shape: f32[1,16,512], index: 3, kind: output, shape index: {}]  }
   0x1   :  { %10 = vsyncpa [#allocation4 + $0x1], 0 }
   0x2   :  { %11 = vsyncpa [#allocation5], 0 }
   0x3   :  { %13 = vsyncpa [#allocation5 + $0x1], 0  ;;  %s949_s12 = smov 0   ;;  %s951_s13 = smov 0  }
   0x4   :  { %s953_s14 = smov 0   ;;  %s955_s15 = smov 0  }
   0x5   :  { %s957_s16 = smov 0   ;;  %s959_s17 = smov 0  }
   0x6 LB: > { %s675_s18 = sadd.s32 4294967295, %s918_s17   ;;  %s676_s19 = sadd.s32 4294967294, %s918_s17   ;;  %s918_s17 = sphi %s959_s17, %s19_s17   ;;  %s914_s16 = sphi %s957_s16, %s1167_s16   ;;  %s910_s15 = sphi %s955_s15, %s1166_s15   ;;  %s906_s14 = sphi %s953_s14, %s1165_s14   ;;  %s902_s13 = sphi %s951_s13, %s1164_s13   ;;  %s898_s12 = sphi %s949_s12, %s1163_s12  }
   0x7   : > { %s37_s20 = sadd.s32 1, %s914_s16  ;;  %s86_s21 = sadd.s32 1, %s906_s14 }
   0x8   : > { %p39_p0 = scmp.ge.s32.totalorder %s37_s20, 2  ;;  %p93_p1 = scmp.ne.s32.totalorder %s906_s14, %s902_s13 }
   0x9   : > { %p94_p2 = scmp.eq.s32.totalorder %s918_s17, 0  ;;  %p99_p3 = scmp.ne.s32.totalorder %s902_s13, %s898_s12 }
   0xa   : > { %s1169_s20 = smov (%p39_p0, %s37_s20), 0  ;;  %p100_p5 = scmp.eq.s32.totalorder %s675_s18, 0 }
   0xb   : > { %p990_p4 = por %p94_p2, %p93_p1  ;;  %s82_s23 = ssub.s32 %s914_s16, %s1169_s20 }
   0xc   : > { %p155_p6 = scmp.eq.s32.totalorder %s675_s18, 1  ;;  %p84_p7 = scmp.eq.s32.totalorder %s82_s23, 0 }
   0xd   : > { %p996_p8 = por %p100_p5, %p99_p3  ;;  %p161_p10 = scmp.eq.s32.totalorder %s676_s19, 1 }
   0xe   : > { %p1000_p9 = por %p155_p6, %p93_p1  ;;  %p723_p13 = scmp.lt.s32.totalorder %s918_s17, 2 }
   0xf   : > { %s1005_s26 = scalar_select %p84_p7, %s906_s14, %s86_s21  }
  0x10   : > { %s1157_s25 = scalar_select %p1000_p9, 1, 0 }
  0x11   : > { %p1007_p11 = por %p161_p10, %p99_p3  ;;  %s210_s28 = sand.u32 1, %s906_s14  }
  0x12   : > { %s681_s29 = sshll.u32 %s210_s28, 7  ;;  %s709_s30 = sshll.u32 %s914_s16, 7 }
  0x13   : > { %s1158_s27 = scalar_select %p1007_p11, 1, 0 }
  0x14   : > { %s1018_s6 = scalar_lea.hbm %s1151_s1, %s709_s30  ;;  %s214_s7 = scalar_lea.vmem [#allocation3], %s681_s29 }
  0x15   : > { %s226_s8 = sshll.u32 %s214_s7, 4  ;;  %p1024_p0 = pnand %p723_p13, %p990_p4  ;;  %s1020_s8 = int_to_ptr.vmem [resolvable:$true] %s226_s8 }
  0x16   : > { %s1028_s10 = scalar_lea.sflag [#allocation4], %s210_s28  ;;  %s806_s11 = scalar_lea.hbm %s1018_s6, 2048 }
  0x17   : > { %p807_p1 = scmp.ne.s32.totalorder %s1018_s6, %s806_s11  ;;  %p808_p2 = pneg %p1024_p0 }
  0x18   : > { %s811_s21 = scalar_lea.hbm %s1151_s1, 4096  ;;  %p812_p4 = scmp.lt.u32.totalorder %s1018_s6, %s1151_s1 }
  0x19   : > { %p809_p3 = pnand %p808_p2, %p807_p1  ;;  %p813_p6 = scmp.lt.u32.totalorder %s811_s21, %s806_s11 }
  0x1a   : > { %p815_p10 = scmp.lt.u32.totalorder %s806_s11, %s1018_s6 }
  0x1b   : > { %p810_p5 = pneg %p809_p3  ;;  %p814_p7 = por %p813_p6, %p812_p4 }
  0x1d   : > { %p816_p13 = por %p815_p10, %p814_p7 }
  0x1f   : > { %p817_p12 = pnand %p816_p13, %p810_p5 }
  0x21   : > { %820 = shalt.err (!%p817_p12)
}
  0x22   : > { %s821_s28 = scalar_lea.vmem %s1020_s8, 2048  ;;  %s920_s29 = smov [#allocation3]  }
  0x23   : > { %p822_p1 = scmp.ne.s32.totalorder %s1020_s8, %s821_s28  ;;  %s826_s30 = sshll.u32 %s920_s29, 4  ;;  %s827_s30 = int_to_ptr.vmem [resolvable:$false] %s826_s30 }
  0x24   : > { %s828_s4 = scalar_lea.vmem %s827_s30, 4096  ;;  %p829_p9 = scmp.lt.s32.totalorder %s1020_s8, %s827_s30 }
  0x25   : > { %p824_p3 = pnand %p822_p1, %p808_p2  ;;  %p830_p4 = scmp.lt.s32.totalorder %s828_s4, %s821_s28 }
  0x27   : > { %p825_p11 = pneg %p824_p3  ;;  %p831_p6 = por %p830_p4, %p829_p9 }
  0x29   : > { %p832_p7 = pnand %p831_p6, %p825_p11 }
  0x2b   : > { %835 = shalt.err (!%p832_p7)
}
  0x2c   : > { %s921_s5 = smov 256   ;;  %s922_s7 = smov 128  }
  0x2d   : > { %s923_s11 = smov 8   ;;  %p684_p12 = scmp.ge.s32.totalorder %s918_s17, 1 }
  0x2e   : > { %718 = dma.hbm_to_vmem [thread:$0]  (!%p1024_p0), %s1018_s6, 2048, %s1020_s8, %s1028_s10, %s921_s5, %s922_s7, %s923_s11  }
  0x2f   : > { %p234_p2 = scmp.lt.s32.totalorder %s918_s17, 3 }
  0x31   : > { %p235_p5 = pnand %p684_p12, %p234_p2 }
  0x32   : > { %s1059_s18 = sand.u32 (!%p235_p5), 1, %s902_s13  }
  0x33   : > { %238 = sbr.rel (%p235_p5) target bundleno = 328 (0x148), region = 32  ;;  %s685_s19 = sshll.u32 (!%p235_p5), %s1059_s18, 7 }
  0x34   : > { %s241_s21 = scalar_lea.sflag (!%p235_p5), [#allocation4], %s1059_s18  ;;  %s1063_s22 = scalar_lea.vmem (!%p235_p5), [#allocation3], %s685_s19 }
  0x3a   : > { %889 = dma.done.wait (%p996_p8), %s241_s21, 2048  }
  0x3b   : > { %891 = vsyncadd (%p996_p8), %s241_s21, 4294965248  ;;  %v924_v0 = vmov 0   ;;  %v781_v1 = vld [vmem:[%s1063_s22 + $0x4] ss:$8 sps:$4 sm:$0xff]   ;;  %v783_v2 = vld [vmem:[%s1063_s22] ss:$8 sps:$4 sm:$0xff]  }
  0x3c   : > { %464 = vmatprep.mubr.bf16.mxu0 %v924_v0  ;;  %780 = vset.pattern.permute.xlu0 %v924_v0  ;;  %v784_v3 = vld [vmem:[%s1063_s22 + $0x14] ss:$8 sps:$4 sm:$0xff]   ;;  %v786_v4 = vld [vmem:[%s1063_s22 + $0x10] ss:$8 sps:$4 sm:$0xff]   ;;  %v787_v5 = vld [vmem:[%s1063_s22 + $0x24] ss:$8 sps:$4 sm:$0xff]  }
  0x3d   : > { %432 = vmatprep.subr.bf16.mxu0 %v781_v1  ;;  %v789_v6 = vld [vmem:[%s1063_s22 + $0x20] ss:$8 sps:$4 sm:$0xff]   ;;  %v790_v7 = vld [vmem:[%s1063_s22 + $0x34] ss:$8 sps:$4 sm:$0xff]   ;;  %v792_v8 = vld [vmem:[%s1063_s22 + $0x30] ss:$8 sps:$4 sm:$0xff]  }
  0x3e   : > { %433 = vmatpush1.bf16.msra.mxu0 %v783_v2  ;;  %v490_v9 = vld [vmem:[%s1152_s2] sm:$0xff]  ;;  %v491_v11 = vld [vmem:[%s1152_s2 + $0x8] sm:$0xff]  ;;  %v796_v13 = vld [vmem:[%s1063_s22 + $0x54] ss:$8 sps:$4 sm:$0xff]   ;;  %s686_s28 = sshll.u32 %s1059_s18, 5  ;;  %s710_s4 = sshll.u32 %s910_s15, 8 }
  0x3f   : > { %434 = vmatprep.subr.bf16.mxu0 %v784_v3  ;;  %v793_v10 = vld [vmem:[%s1063_s22 + $0x44] ss:$8 sps:$4 sm:$0xff]   ;;  %494 = vperm.xlu0 %780, %v490_v9   ;;  %v795_v12 = vld [vmem:[%s1063_s22 + $0x40] ss:$8 sps:$4 sm:$0xff]   ;;  %v798_v14 = vld [vmem:[%s1063_s22 + $0x50] ss:$8 sps:$4 sm:$0xff]   ;;  %s1101_s11 = scalar_lea.hbm %s1153_s3, %s710_s4 }
  0x40   : > { %v799_v15 = vld [vmem:[%s1063_s22 + $0x64] ss:$8 sps:$4 sm:$0xff]   ;;  %v801_v16 = vld [vmem:[%s1063_s22 + $0x60] ss:$8 sps:$4 sm:$0xff]   ;;  %v802_v17 = vld [vmem:[%s1063_s22 + $0x74] ss:$8 sps:$4 sm:$0xff]  }
  0x41   : > { %v804_v18 = vld [vmem:[%s1063_s22 + $0x70] ss:$8 sps:$4 sm:$0xff]   ;;  %v805_v19 = vld [vmem:[%s1150_s0] sm:$0xff]   ;;  %s287_s29 = scalar_lea.vmem [#allocation6], %s686_s28  ;;  %s515_s15 = scalar_lea.sflag [#allocation5], %s1059_s18 }
  0x42   : > { %435 = vmatpush1.bf16.msra.mxu0 %v786_v4  ;;  %s533_s30 = sshll.u32 %s287_s29, 4  ;;  %p1160_p9 = scmp.ne.s32.totalorder %s1157_s25, 0  ;;  %s1096_s30 = int_to_ptr.vmem [resolvable:$true] %s533_s30 }
  0x43   : > { %436 = vmatprep.subr.bf16.mxu0 %v787_v5  ;;  %499 = vperm.xlu0 %780, %v491_v11   ;;  %s836_s19 = scalar_lea.vmem %s1096_s30, 512  ;;  %s925_s21 = smov [#allocation6]  }
  0x44   : > { %p837_p8 = scmp.ne.s32.totalorder %s1096_s30, %s836_s19  ;;  %s840_s22 = sshll.u32 %s925_s21, 4  ;;  %s841_s22 = int_to_ptr.vmem [resolvable:$false] %s840_s22 }
  0x45   : > { %s842_s24 = scalar_lea.vmem %s841_s22, 1024  ;;  %p843_p10 = scmp.lt.s32.totalorder %s1096_s30, %s841_s22 }
  0x46   : > { %437 = vmatpush1.bf16.msra.mxu0 %v789_v6  ;;  %p838_p11 = pnand %p837_p8, %p1160_p9  ;;  %p844_p13 = scmp.lt.s32.totalorder %s842_s24, %s836_s19 }
  0x47   : > { %438 = vmatprep.subr.bf16.mxu0 %v790_v7 }
  0x48   : > { %p839_p0 = pneg %p838_p11  ;;  %p845_p1 = por %p844_p13, %p843_p10 }
  0x4a   : > { %439 = vmatpush1.bf16.msra.mxu0 %v792_v8  ;;  %p846_p3 = pnand %p845_p1, %p839_p0 }
  0x4b   : > { %440 = vmatprep.subr.bf16.mxu0 %v793_v10 }
  0x4e   : > { %441 = vmatpush1.bf16.msra.mxu0 %v795_v12 }
  0x4f   : > { %442 = vmatprep.subr.bf16.mxu0 %v796_v13 }
  0x52   : > { %443 = vmatpush1.bf16.msra.mxu0 %v798_v14 }
  0x53   : > { %444 = vmatprep.subr.bf16.mxu0 %v799_v15 }
  0x56   : > { %445 = vmatpush1.bf16.msra.mxu0 %v801_v16 }
  0x57   : > { %446 = vmatprep.subr.bf16.mxu0 %v802_v17 }
  0x5a   : > { %447 = vmatpush1.bf16.msra.mxu0 %v804_v18 }
  0x5d   : > { %465 = vmatmul.mubr.bf16.vlgmr.msra.gmra.mrb[0].mxu0 %v805_v19 }
  0xbe   : > { %v495_v20 = vpop.permute.xlu0 %494 }
  0xc2   : > { %v500_v24 = vpop.permute.xlu0 %499 }
 0x130   : > { %v466_v21 = vpop.f32.mrb[0].mxu0 }
 0x131   : > { %v502_v22 = vadd.f32 %v495_v20, %v466_v21  ;;  %v468_v23 = vpop.f32.mrb[1].mxu0 }
 0x132   : > { %v503_v25 = vadd.f32 %v495_v20, %v468_v23  ;;  %v470_v26 = vpop.f32.mrb[2].mxu0 }
 0x133   : > { %v506_v27 = vmax.f32 %v502_v22, 0.0  ;;  %v504_v28 = vadd.f32 %v500_v24, %v470_v26  ;;  %v472_v29 = vpop.f32.mrb[3].mxu0 }
 0x134   : > { %v507_v30 = vmax.f32 %v503_v25, 0.0  ;;  %v505_v31 = vadd.f32 %v500_v24, %v472_v29 }
 0x135   : > { %510 = vst [vmem:[%s287_s29] sm:$0xff] %v506_v27  ;;  %v508_v32 = vmax.f32 %v504_v28, 0.0 }
 0x136   : > { %511 = vst [vmem:[%s287_s29 + $0x8] sm:$0xff] %v507_v30  ;;  %v509_v33 = vmax.f32 %v505_v31, 0.0 }
 0x137   : > { %512 = vst [vmem:[%s287_s29 + $0x10] sm:$0xff] %v508_v32 }
 0x138   : > { %513 = vst [vmem:[%s287_s29 + $0x18] sm:$0xff] %v509_v33 }
 0x139   : > { %849 = shalt.err (!%p846_p3)
}
 0x13a   : > { %s850_s6 = scalar_lea.hbm %s1101_s11, 512  ;;  %s854_s10 = scalar_lea.hbm %s1153_s3, 1024 }
 0x13b   : > { %p851_p4 = scmp.ne.s32.totalorder %s1101_s11, %s850_s6  ;;  %p855_p12 = scmp.lt.u32.totalorder %s1101_s11, %s1153_s3 }
 0x13c   : > { %p856_p2 = scmp.lt.u32.totalorder %s854_s10, %s850_s6  ;;  %p858_p8 = scmp.lt.u32.totalorder %s850_s6, %s1101_s11 }
 0x13d   : > { %p852_p6 = pnand %p851_p4, %p1160_p9 }
 0x13e   : > { %p857_p5 = por %p856_p2, %p855_p12 }
 0x13f   : > { %p853_p7 = pneg %p852_p6 }
 0x140   : > { %p859_p11 = por %p858_p8, %p857_p5 }
 0x142   : > { %p860_p0 = pnand %p859_p11, %p853_p7 }
 0x144   : > { %863 = shalt.err (!%p860_p0)
}
 0x145   : > { %s926_s29 = smov 256   ;;  %s927_s4 = smov 512  }
 0x146   : > { %s928_s5 = smov 16  }
 0x147   : > { %713 = dma.vmem_to_hbm [thread:$0]  (%p1160_p9), %s1096_s30, 512, %s1101_s11, %s515_s15, %s926_s29, %s927_s4, %s928_s5  }
 0x148 PF: > { %s548_s7 = sand.u32 1, %s898_s12   ;;  %p1161_p10 = scmp.ne.s32.totalorder %s1158_s27, 0 }
 0x149   : > { %p1162_p13 = scmp.ge.s32.totalorder %s918_s17, 2  ;;  %s549_s19 = scalar_lea.sflag [#allocation5], %s548_s7 }
 0x14b   : > { %p720_p1 = pnand %p1162_p13, %p1161_p10 }
 0x14d   : > { %893 = dma.done.wait (!%p720_p1), %s549_s19, 512  }
 0x14e   : > { %895 = vsyncadd (!%p720_p1), %s549_s19, 4294966784  ;;  %s19_s17 = sadd.s32 1, %s918_s17   ;;  %s1163_s12 = smov %s902_s13 }
 0x14f   : > { %p16_p3 = scmp.ge.s32.totalorder %s19_s17, 4   ;;  %s1164_s13 = smov %s906_s14 }
 0x150   : > { %s1165_s14 = smov %s1005_s26  ;;  %s1166_s15 = smov %s914_s16 }
 0x151   : > { %s1167_s16 = smov %s1169_s20  ;;  %18 = sbr.rel (!%p16_p3) target bundleno = 6 (0x6), region = 91 }
 0x158   :  { %554 = vsyncpa [#allocation4], 1 }
 0x159   :  { %556 = vsyncpa [#allocation4 + $0x1], 1 }
 0x15a   :  { %557 = vsyncpa [#allocation5], 1 }
 0x15b   :  { %559 = vsyncpa [#allocation5 + $0x1], 1 }

</bundles_post_ra>
